<compile_context>
chip_gen: v5e
topology: v5e:2x2
jax: 0.10.0
libtpu: 0.0.40
codegen_flags: <defaults>
</compile_context>

<pallas_src>
import jax
import jax.numpy as jnp
from jax.experimental import pallas as pl
from jax.experimental.pallas import tpu as pltpu


def _round_up(n, m):
    return ((n + m - 1) // m) * m


def simple_nn_kernel(x_ref, w1t_ref, w2t_ref, o_ref):
    # bf16 MXU operands, f32 accumulation; ReLU on the f32 accumulator (VPU).
    x = x_ref[...].astype(w1t_ref.dtype)                         # (TB, D_in) bf16
    h = jnp.dot(x, w1t_ref[...],
                preferred_element_type=jnp.float32)              # (TB, D_hid_p) f32
    h = jnp.maximum(h, 0.0)                                      # ReLU
    out = jnp.dot(h.astype(w2t_ref.dtype), w2t_ref[...],
                  preferred_element_type=jnp.float32)            # (TB, D_out_p) f32
    o_ref[...] = out.astype(o_ref.dtype)


def prepare_simple_nn_params(w1, w2, compute_dtype=jnp.bfloat16):
    """One-time weight prep (model init), NOT per forward call.

    w1: (D_hid, D_in), w2: (D_out, D_hid)  -- PyTorch Linear layout.
    Returns lane-padded, pre-transposed weights in the MXU compute dtype.
    """
    D_hid, D_in = w1.shape
    D_out = w2.shape[0]
    D_hid_p = _round_up(D_hid, 128)
    D_out_p = _round_up(D_out, 128)
    w1t = jnp.zeros((D_in, D_hid_p), compute_dtype).at[:, :D_hid].set(
        w1.T.astype(compute_dtype))
    w2t = jnp.zeros((D_hid_p, D_out_p), compute_dtype).at[:D_hid, :D_out].set(
        w2.T.astype(compute_dtype))
    return w1t, w2t, D_out


def simple_nn_forward(x, w1t, w2t, d_out, *, batch_tile=1024):
    """x: (B, D_in) activations; w1t/w2t from prepare_simple_nn_params."""
    B, D_in = x.shape
    D_hid_p, D_out_p = w2t.shape
    assert w1t.shape == (D_in, D_hid_p)

    # Batch tile: multiple of 16 sublanes, capped for VMEM headroom on all chips
    # (v7x has only 64 MiB per TC). Pad batch to a whole number of tiles.
    tb = min(batch_tile, _round_up(B, 16))
    Bp = _round_up(B, tb)
    x_p = x if Bp == B else jnp.zeros((Bp, D_in), x.dtype).at[:B].set(x)

    flops = 2 * Bp * (D_in * D_hid_p + D_hid_p * D_out_p)
    bytes_accessed = (Bp * D_in * x.dtype.itemsize
                      + w1t.size * w1t.dtype.itemsize
                      + w2t.size * w2t.dtype.itemsize
                      + Bp * D_out_p * jnp.dtype(x.dtype).itemsize)

    out_p = pl.pallas_call(
        simple_nn_kernel,
        out_shape=jax.ShapeDtypeStruct((Bp, D_out_p), x.dtype),
        grid_spec=pltpu.PrefetchScalarGridSpec(
            num_scalar_prefetch=0,
            grid=(Bp // tb,),
            in_specs=[
                # x tile streams over batch (double-buffered by Pallas).
                pl.BlockSpec((tb, D_in), lambda i: (i, 0)),
                # Weights: constant index_map -> stay VMEM-resident across steps.
                pl.BlockSpec((D_in, D_hid_p), lambda i: (0, 0)),
                pl.BlockSpec((D_hid_p, D_out_p), lambda i: (0, 0)),
            ],
            out_specs=pl.BlockSpec((tb, D_out_p), lambda i: (i, 0)),
        ),
        compiler_params=pltpu.CompilerParams(
            dimension_semantics=("parallel",),        # v7x megacore; no-op on v5e/v6e
            vmem_limit_bytes=32 * 1024 * 1024,        # explicit; well under v7x 64 MiB
        ),
        cost_estimate=pl.CostEstimate(
            flops=flops, transcendentals=0, bytes_accessed=bytes_accessed),
    )(x_p, w1t, w2t)

    # TODO(synk): for very large, HBM-bound B, consider emitting a (Bp, d_out)
    # output (full-array last dim, masked vst) to cut writeback bytes 16x
    # instead of the lane-dense padded slab sliced here.
    return out_p[:B, :d_out]


if __name__ == "__main__":
    # Shapes implied by the module: input_size=32 -> hidden=16, output_size=8, batch=8.
    batch, input_size, output_size = 8, 32, 8
    hidden = input_size // 2

    key = jax.random.PRNGKey(0)
    kx, k1, k2 = jax.random.split(key, 3)

    x = jax.random.normal(kx, (batch, input_size), dtype=jnp.float32)
    # PyTorch Linear weight shape: (out_features, in_features)
    w1 = jax.random.normal(k1, (hidden, input_size), dtype=jnp.float32) * 0.1
    w2 = jax.random.normal(k2, (output_size, hidden), dtype=jnp.float32) * 0.1

    # One-time weight prep (model init time).
    w1t, w2t, d_out = prepare_simple_nn_params(w1, w2)
    jax.block_until_ready((w1t, w2t))

    out = simple_nn_forward(x, w1t, w2t, d_out)
    jax.block_until_ready(out)

    # Reference of the PyTorch forward (f32). bf16 MXU operands -> relaxed tolerance.
    ref = jnp.maximum(x @ w1.T, 0.0) @ w2.T
    assert out.shape == (batch, output_size)
    assert jnp.allclose(out, ref, atol=2e-2, rtol=2e-2), (
        f"max abs err {jnp.max(jnp.abs(out - ref))}")

    print("KERNEL_OK")
</pallas_src>

<mosaic_0001>
module attributes {stable_mosaic.version = 11 : i64} {
  func.func @simple_nn_kernel(%arg0: i32, %arg1: memref<16x32xf32, #tpu.memory_space<vmem>>, %arg2: memref<32x128xbf16, #tpu.memory_space<vmem>>, %arg3: memref<128x128xbf16, #tpu.memory_space<vmem>>, %arg4: memref<16x128xf32, #tpu.memory_space<vmem>>) attributes {dimension_semantics = [#tpu.dimension_semantics<parallel>], iteration_bounds = array<i64: 1>, scalar_prefetch = 0 : i64, scratch_operands = 0 : i64, tpu.core_type = #tpu.core_type<tc>, window_params = [{transform_indices = @transform_0, window_bounds = array<i64: 16, 32>}, {pipeline_mode = #tpu.pipeline_mode<synchronous>, transform_indices = @transform_1, window_bounds = array<i64: 32, 128>}, {pipeline_mode = #tpu.pipeline_mode<synchronous>, transform_indices = @transform_2, window_bounds = array<i64: 128, 128>}, {transform_indices = @transform_3, window_bounds = array<i64: 16, 128>}]} {
    %c0 = arith.constant 0 : index
    %c0_0 = arith.constant 0 : index
    %0 = vector.load %arg1[%c0, %c0_0] : memref<16x32xf32, #tpu.memory_space<vmem>>, vector<16x32xf32>
    %1 = arith.truncf %0 : vector<16x32xf32> to vector<16x32xbf16>
    %c0_1 = arith.constant 0 : index
    %c0_2 = arith.constant 0 : index
    %2 = vector.load %arg2[%c0_1, %c0_2] : memref<32x128xbf16, #tpu.memory_space<vmem>>, vector<32x128xbf16>
    %cst = arith.constant dense<0.000000e+00> : vector<16x128xf32>
    %3 = tpu.matmul %1, %2, %cst {dimension_numbers = #tpu.dot_dimension_numbers<[1], [0], [0], [1], [0, 0, 1, 1], [], []>} : vector<16x32xbf16>, vector<32x128xbf16>, vector<16x128xf32> -> vector<16x128xf32>
    %cst_3 = arith.constant 0.000000e+00 : f32
    %4 = vector.broadcast %cst_3 : f32 to vector<16x128xf32>
    %5 = arith.maximumf %3, %4 : vector<16x128xf32>
    %6 = arith.truncf %5 : vector<16x128xf32> to vector<16x128xbf16>
    %c0_4 = arith.constant 0 : index
    %c0_5 = arith.constant 0 : index
    %7 = vector.load %arg3[%c0_4, %c0_5] : memref<128x128xbf16, #tpu.memory_space<vmem>>, vector<128x128xbf16>
    %cst_6 = arith.constant dense<0.000000e+00> : vector<16x128xf32>
    %8 = tpu.matmul %6, %7, %cst_6 {dimension_numbers = #tpu.dot_dimension_numbers<[1], [0], [0], [1], [0, 0, 1, 1], [], []>} : vector<16x128xbf16>, vector<128x128xbf16>, vector<16x128xf32> -> vector<16x128xf32>
    %c0_7 = arith.constant 0 : index
    %c0_8 = arith.constant 0 : index
    %9 = vector.load %arg4[%c0_7, %c0_8] : memref<16x128xf32, #tpu.memory_space<vmem>>, vector<16x128xf32>
    tpu.vector_store %arg4[%c0_7, %c0_8], %8 {strides = array<i32>} : memref<16x128xf32, #tpu.memory_space<vmem>>, vector<16x128xf32>,
    return
  }
  func.func @transform_0(%arg0: i32) -> (i32, i32) {
    %c0_i32 = arith.constant 0 : i32
    %c0_i32_0 = arith.constant 0 : i32
    return %arg0, %c0_i32 : i32, i32
  }
  func.func @transform_1(%arg0: i32) -> (i32, i32) {
    %c0_i32 = arith.constant 0 : i32
    %c0_i32_0 = arith.constant 0 : i32
    %c0_i32_1 = arith.constant 0 : i32
    return %c0_i32, %c0_i32_0 : i32, i32
  }
  func.func @transform_2(%arg0: i32) -> (i32, i32) {
    %c0_i32 = arith.constant 0 : i32
    %c0_i32_0 = arith.constant 0 : i32
    %c0_i32_1 = arith.constant 0 : i32
    return %c0_i32, %c0_i32_0 : i32, i32
  }
  func.func @transform_3(%arg0: i32) -> (i32, i32) {
    %c0_i32 = arith.constant 0 : i32
    %c0_i32_0 = arith.constant 0 : i32
    return %arg0, %c0_i32 : i32, i32
  }
}

</mosaic_0001>

<bundles_post_ra>
// kernel: tpu_custom_call.1
= control target key start
LH: loop header
LB: loop body
LE: loop exit
PB: predicated region body
PF: predicated region fallthrough
CT: control target
= control target key end

     0   :  { %8 = vsyncpa [#allocation3], 0  ;;  %s410_s0 = inlined_call_operand.hbm [shape: f32[16,32], index: 0, kind: input, shape index: {}]   ;;  %s411_s1 = inlined_call_operand.hbm [shape: bf16[32,128], index: 1, kind: input, shape index: {}]   ;;  %s412_s2 = inlined_call_operand.hbm [shape: bf16[128,128], index: 2, kind: input, shape index: {}]   ;;  %s413_s3 = inlined_call_operand.hbm [shape: f32[16,128], index: 3, kind: output, shape index: {}]  }
   0x1   :  { %9 = vsyncpa [#allocation6], 0  ;;  %s28_s14 = sshll.u32 %s411_s1, 4  ;;  %s29_s14 = int_to_ptr.hbm [resolvable:$true] %s28_s14 }
   0x2   :  { %10 = vsyncpa [#allocation4], 0  ;;  %s364_s15 = smov [#allocation5]   ;;  %s15_s19 = sshll.u32 %s410_s0, 4  ;;  %s16_s19 = int_to_ptr.hbm [resolvable:$true] %s15_s19 }
   0x3   :  { %s30_s16 = sshll.u32 %s364_s15, 4  ;;  %s365_s20 = smov 64   ;;  %s31_s16 = int_to_ptr.vmem [resolvable:$true] %s30_s16 }
   0x4   :  { %s366_s21 = smov 4   ;;  %s367_s22 = smov [#allocation2]  }
   0x5   :  { %36 = dma.hbm_to_vmem [thread:$0]  %s29_s14, 256, %s31_s16, [#allocation6], %s365_s20, %s365_s20, %s366_s21  }
   0x6   :  { %s17_s23 = sshll.u32 %s367_s22, 4  ;;  %s368_s24 = smov 128   ;;  %s18_s23 = int_to_ptr.vmem [resolvable:$true] %s17_s23 }
   0x7   :  { %s369_s25 = smov 8   ;;  %s41_s27 = sshll.u32 %s412_s2, 4  ;;  %s42_s27 = int_to_ptr.hbm [resolvable:$true] %s41_s27 }
   0x8   :  { %23 = dma.hbm_to_vmem [thread:$0]  %s16_s19, 256, %s18_s23, [#allocation3], %s368_s24, %s368_s24, %s369_s25  }
   0x9   :  { %s370_s28 = smov [#allocation7]  }
   0xa   :  { %s43_s0 = sshll.u32 %s370_s28, 4  ;;  %s44_s0 = int_to_ptr.vmem [resolvable:$true] %s43_s0 }
   0xb   :  { %49 = dma.hbm_to_vmem [thread:$0]  %s42_s27, 1024, %s44_s0, [#allocation6], %s365_s20, %s365_s20, %s366_s21  }
   0xc   :  { %358 = dma.done.wait [#allocation3], 256  }
   0xd   :  { %359 = vsyncadd [#allocation3], 4294967040 }
   0xe   :  { %360 = dma.done.wait [#allocation6], 1280  }
   0xf   :  { %361 = vsyncadd [#allocation6], 4294966016  ;;  %v245_v0 = vld [vmem:[#allocation5 + $0x8] sm:$0xff]  ;;  %v244_v2 = vld [vmem:[#allocation5] sm:$0xff]  ;;  %vm82_vm0 = vcmask 261120   ;;  %s371_s2 = smov [#allocation8]  }
  0x10   :  { %v253_v1 = vld [vmem:[#allocation7 + $0x38] sm:$0xff]  ;;  %92 = vmatpush.bf16.msra.mxu0 %v245_v0  ;;  %v63_v3 = vld [vmem:[#allocation2] sm:$0xff]  ;;  %v64_v4 = vld [vmem:[#allocation2 + $0x8] sm:$0xff]  ;;  %s187_s29 = sshll.u32 %s371_s2, 4  ;;  %s189_s5 = sshll.u32 %s413_s3, 4  ;;  %s188_s29 = int_to_ptr.vmem [resolvable:$true] %s187_s29  ;;  %s190_s5 = int_to_ptr.hbm [resolvable:$true] %s189_s5 }
  0x11   :  { %167 = vmatpush.bf16.msra.mxu1 %v253_v1  ;;  %v252_v5 = vld [vmem:[#allocation7 + $0x30] sm:$0xff]  ;;  %v65_v6 = vpack.c.bf16 %v64_v4, %v63_v3  ;;  %v251_v7 = vld [vmem:[#allocation7 + $0x28] sm:$0xff]  ;;  %v250_v8 = vld [vmem:[#allocation7 + $0x20] sm:$0xff] }
  0x12   :  { %v249_v9 = vld [vmem:[#allocation7 + $0x18] sm:$0xff]  ;;  %v248_v10 = vld [vmem:[#allocation7 + $0x10] sm:$0xff]  ;;  %v247_v11 = vld [vmem:[#allocation7 + $0x8] sm:$0xff] }
  0x13   :  { %v246_v12 = vld [vmem:[#allocation7] sm:$0xff] }
  0x14   :  { %93 = vmatpush.bf16.msra.mxu0 %v244_v2 }
  0x15   :  { %168 = vmatpush.bf16.msra.mxu1 %v252_v5 }
  0x17   :  { %211 = vmatmul.msk.bf16.vlgmr.msra.gmra.mxu0 %vm82_vm0, %v65_v6 }
  0x19   :  { %169 = vmatpush.bf16.msra.mxu1 %v251_v7 }
  0x1d   :  { %170 = vmatpush.bf16.msra.mxu1 %v250_v8 }
  0x21   :  { %171 = vmatpush.bf16.msra.mxu1 %v249_v9 }
  0x25   :  { %172 = vmatpush.bf16.msra.mxu1 %v248_v10 }
  0x29   :  { %173 = vmatpush.bf16.msra.mxu1 %v247_v11 }
  0x2d   :  { %174 = vmatpush.bf16.msra.mxu1 %v246_v12 }
  0x94   :  { %v95_v13 = vpop.f32.mrf.mxu0 }
  0x95   :  { %v100_v15 = vmax.f32 %v95_v13, 0.0 }
  0x9c   :  { %v97_v14 = vpop.f32.mrf.mxu0 }
  0x9d   :  { %v101_v16 = vmax.f32 %v97_v14, 0.0 }
  0x9f   :  { %v102_v17 = vpack.c.bf16 %v101_v16, %v100_v15 }
  0xa1   :  { %175 = vmatmul.bf16.vlgmr.msra.gmra.mxu1 %v102_v17 }
 0x11e   :  { %v176_v18 = vpop.f32.mrf.mxu1 }
 0x11f   :  { %181 = vst [vmem:[#allocation8] sm:$0xff] %v176_v18 }
 0x126   :  { %v178_v19 = vpop.f32.mrf.mxu1 }
 0x127   :  { %182 = vst [vmem:[#allocation8 + $0x8] sm:$0xff] %v178_v19 }
 0x128   :  { %195 = dma.vmem_to_hbm [thread:$0]  %s188_s29, 256, %s190_s5, [#allocation4], %s368_s24, %s368_s24, %s369_s25  }
 0x129   :  { %362 = dma.done.wait [#allocation4], 256  }
 0x12a   :  { %363 = vsyncadd [#allocation4], 4294967040 }
 0x12b   :  { %200 = vsyncpa [#allocation3], 1 }
 0x12c   :  { %201 = vsyncpa [#allocation6], 1 }
 0x12d   :  { %202 = vsyncpa [#allocation4], 1 }

</bundles_post_ra>
